<compile_context>
chip_gen: v6e
topology: v6e:2x2x1
jax: 0.10.0
libtpu: 0.0.40
codegen_flags: <defaults>
</compile_context>

<pallas_src>
import jax
import jax.numpy as jnp
from jax.experimental import pallas as pl
from jax.experimental.pallas import tpu as pltpu


def graphsage_kernel(a_ref, xn_ref, xi_ref, dinv_ref,
                     wl_ref, bl_ref, wr_ref, w2_ref, b2_ref,
                     out_ref, acc_ref):
    k = pl.program_id(1)

    @pl.when(k == 0)
    def _init():
        acc_ref[...] = jnp.zeros_like(acc_ref)

    # ---- neighbor-sum: Adj_counts @ xn, tiled over K (bf16 MXU, f32 accumulate) ----
    acc_ref[...] += jnp.dot(a_ref[...], xn_ref[...],
                            preferred_element_type=jnp.float32)

    @pl.when(k == pl.num_programs(1) - 1)
    def _epilogue():
        # mean aggregation: scale the f32 sum by per-row 1/deg (exact, no bf16 error)
        h_agg = acc_ref[...] * dinv_ref[...]                    # [TM, F_agg] f32
        xi = xi_ref[...].astype(jnp.float32)                    # [TM, Cin]  root features

        # SAGEConv (aggr='mean', root_weight=True): lin_l(mean_neigh) + lin_r(x)
        h = (jnp.dot(h_agg, wl_ref[...], preferred_element_type=jnp.float32)
             + bl_ref[...]
             + jnp.dot(xi, wr_ref[...], preferred_element_type=jnp.float32))

        # ReLU
        h = jnp.maximum(h, jnp.float32(0.0))

        # Dropout: identity (eval / inference semantics)
        # TODO(synk): training-mode dropout RNG not reproduced (no torch-RNG parity).

        # Linear(hidden -> out)
        logits = jnp.dot(h, w2_ref[...], preferred_element_type=jnp.float32) + b2_ref[...]

        # log_softmax over dim=1 (numerically stable)
        m = jnp.max(logits, axis=-1, keepdims=True)
        shifted = logits - m
        lse = jnp.log(jnp.sum(jnp.exp(shifted), axis=-1, keepdims=True))
        out_ref[...] = shifted - lse


def _round_up(a, b):
    return (a + b - 1) // b * b


def _pick_tiles(n):
    """Row tile TM / reduction tile TK.

    TK is grown aggressively (HBM-bound on the A stream; big tiles amortize the
    ~0.35 us/grid-step overhead); TM stays at 128/256 because the accumulator and
    epilogue intermediates are lane-sparse (Cin, H, C << 128) and scale with TM.
    """
    n_pad = _round_up(n, 128)
    if n_pad <= 1024:
        tk = n_pad                       # single reduction step for small graphs
    else:
        n_pad = _round_up(n, 512)
        tk = next(t for t in (2048, 1024, 512) if n_pad % t == 0)
    tm = 256 if n_pad % 256 == 0 else 128
    return n_pad, tm, tk


def build_adjacency(edge_index, n):
    """Dense edge-count adjacency (counts[i, j] = #edges j -> i) and per-row 1/deg."""
    # TODO(synk): O(N^2) dense glue; large graphs need a sparse CSR scalar-prefetch
    # gather aggregation path instead of materializing the dense adjacency.
    src, dst = edge_index[0], edge_index[1]
    counts = jnp.zeros((n, n), jnp.float32).at[dst, src].add(1.0)
    deg = jnp.sum(counts, axis=1, keepdims=True)
    deg_inv = jnp.where(deg > 0, 1.0 / deg, 0.0)   # isolated nodes -> zero neighbor mean
    return counts, deg_inv


def graphsage_forward(x, edge_index, params):
    """x: [N, Cin] f32; edge_index: [2, E] int32 (row 0 = src, row 1 = dst)."""
    N, Cin = x.shape
    wl, bl, wr, w2, b2 = params
    H = wl.shape[1]
    C = w2.shape[1]

    counts, deg_inv = build_adjacency(edge_index, N)

    # If Cin > H (realistic GraphSAGE widths), pre-project the neighbor stream:
    # A @ (x @ wl) == (A @ x) @ wl  -> smaller streamed operand and accumulator.
    if Cin > H:
        xn = x @ wl                                     # [N, H]
        wl_eff = jnp.eye(H, dtype=jnp.float32)
    else:
        xn = x                                          # [N, Cin]
        wl_eff = wl
    f_agg = xn.shape[1]

    n_pad, tm, tk = _pick_tiles(N)
    pad_n = n_pad - N
    grid = (n_pad // tm, n_pad // tk)

    # Pad node dims; dominant streams (adjacency counts, features) in bf16.
    # Counts are small integers -> exact in bf16; 1/deg scaling stays in f32.
    a_pad = jnp.pad(counts, ((0, pad_n), (0, pad_n))).astype(jnp.bfloat16)
    xn_pad = jnp.pad(xn, ((0, pad_n), (0, 0))).astype(jnp.bfloat16)
    xi_pad = jnp.pad(x, ((0, pad_n), (0, 0))).astype(jnp.bfloat16)
    dinv_pad = jnp.pad(deg_inv, ((0, pad_n), (0, 0)))   # [n_pad, 1] f32

    out_pad = pl.pallas_call(
        graphsage_kernel,
        out_shape=jax.ShapeDtypeStruct((n_pad, C), jnp.float32),
        grid_spec=pltpu.PrefetchScalarGridSpec(
            num_scalar_prefetch=0,
            grid=grid,
            in_specs=[
                pl.BlockSpec((tm, tk), lambda i, k: (i, k)),      # Adj counts  (bf16)
                pl.BlockSpec((tk, f_agg), lambda i, k: (k, 0)),   # xn[k-block] (bf16)
                pl.BlockSpec((tm, Cin), lambda i, k: (i, 0)),     # x[i-block]  (bf16)
                pl.BlockSpec((tm, 1), lambda i, k: (i, 0)),       # deg_inv     (f32)
                pl.BlockSpec((f_agg, H), lambda i, k: (0, 0)),    # wl (or eye)
                pl.BlockSpec((1, H), lambda i, k: (0, 0)),        # bl
                pl.BlockSpec((Cin, H), lambda i, k: (0, 0)),      # wr
                pl.BlockSpec((H, C), lambda i, k: (0, 0)),        # w2
                pl.BlockSpec((1, C), lambda i, k: (0, 0)),        # b2
            ],
            out_specs=pl.BlockSpec((tm, C), lambda i, k: (i, 0)),
            scratch_shapes=[pltpu.VMEM((tm, f_agg), jnp.float32)],  # neighbor-sum acc
        ),
        compiler_params=pltpu.CompilerParams(
            dimension_semantics=("parallel", "arbitrary"),
            vmem_limit_bytes=48 * 1024 * 1024,
        ),
    )(a_pad, xn_pad, xi_pad, dinv_pad, wl_eff, bl[None, :], wr, w2, b2[None, :])

    out = out_pad[:N]
    label = jnp.argmax(out, axis=-1)      # argmax in the wrapper (XLA fuses it; no
    return label, out                     # lane-sparse (N,1) int32 kernel output)


def init_params(key, in_channels, hidden_channels, out_channels):
    k1, k2, k3, k4, k5 = jax.random.split(key, 5)
    s1 = 1.0 / jnp.sqrt(in_channels)
    s2 = 1.0 / jnp.sqrt(hidden_channels)
    # Stored already transposed ([in, out]) for direct use in x @ W.
    wl = jax.random.uniform(k1, (in_channels, hidden_channels), jnp.float32, -s1, s1)  # lin_l.weight.T
    bl = jax.random.uniform(k2, (hidden_channels,), jnp.float32, -s1, s1)              # lin_l.bias
    wr = jax.random.uniform(k3, (in_channels, hidden_channels), jnp.float32, -s1, s1)  # lin_r.weight.T
    w2 = jax.random.uniform(k4, (hidden_channels, out_channels), jnp.float32, -s2, s2) # Linear.weight.T
    b2 = jax.random.uniform(k5, (out_channels,), jnp.float32, -s2, s2)                 # Linear.bias
    return wl, bl, wr, w2, b2


def _reference(x, edge_index, params):
    wl, bl, wr, w2, b2 = params
    counts, deg_inv = build_adjacency(edge_index, x.shape[0])
    a_mean = counts * deg_inv
    h = jnp.maximum(a_mean @ x @ wl + bl + x @ wr, 0.0)
    return jax.nn.log_softmax(h @ w2 + b2, axis=1)


if __name__ == "__main__":
    key = jax.random.PRNGKey(0)

    # ---- test 1: toy graph (single-K-step path), Cin < H ----
    N, E = 16, 40
    in_channels, hidden_channels, out_channels = 8, 32, 4
    kx, ke1, ke2, kp, key = jax.random.split(key, 5)
    x = jax.random.normal(kx, (N, in_channels), jnp.float32)
    edge_index = jnp.stack([jax.random.randint(ke1, (E,), 0, N, dtype=jnp.int32),
                            jax.random.randint(ke2, (E,), 0, N, dtype=jnp.int32)], axis=0)
    params = init_params(kp, in_channels, hidden_channels, out_channels)

    label, out = graphsage_forward(x, edge_index, params)
    jax.block_until_ready((label, out))

    assert out.shape == (N, out_channels) and out.dtype == jnp.float32
    assert label.shape == (N,)
    assert bool(jnp.allclose(jnp.sum(jnp.exp(out), axis=1), 1.0, atol=1e-5))
    ref = _reference(x, edge_index, params)
    assert bool(jnp.allclose(out, ref, atol=5e-2, rtol=5e-2))
    assert bool(jnp.array_equal(label, jnp.argmax(ref, axis=-1)))

    # ---- test 2: larger graph (multi-row-tile, multi-K-step, Cin > H pre-projection) ----
    N2, E2 = 1500, 6000
    in2, hid2, out2 = 64, 32, 4
    kx, ke1, ke2, kp, key = jax.random.split(key, 5)
    x2 = jax.random.normal(kx, (N2, in2), jnp.float32)
    edge_index2 = jnp.stack([jax.random.randint(ke1, (E2,), 0, N2, dtype=jnp.int32),
                             jax.random.randint(ke2, (E2,), 0, N2, dtype=jnp.int32)], axis=0)
    params2 = init_params(kp, in2, hid2, out2)

    label2, out2_lp = graphsage_forward(x2, edge_index2, params2)
    jax.block_until_ready((label2, out2_lp))

    assert out2_lp.shape == (N2, out2)
    assert bool(jnp.allclose(jnp.sum(jnp.exp(out2_lp), axis=1), 1.0, atol=1e-4))
    ref2 = _reference(x2, edge_index2, params2)
    assert bool(jnp.allclose(out2_lp, ref2, atol=5e-2, rtol=5e-2))

    print("KERNEL_OK")
</pallas_src>

<mosaic_0001>
module attributes {stable_mosaic.version = 11 : i64} {
  func.func @graphsage_kernel(%arg0: i32, %arg1: i32, %arg2: memref<128x128xbf16, #tpu.memory_space<vmem>>, %arg3: memref<128x8xbf16, #tpu.memory_space<vmem>>, %arg4: memref<128x8xbf16, #tpu.memory_space<vmem>>, %arg5: memref<128x1xf32, #tpu.memory_space<vmem>>, %arg6: memref<8x32xf32, #tpu.memory_space<vmem>>, %arg7: memref<1x32xf32, #tpu.memory_space<vmem>>, %arg8: memref<8x32xf32, #tpu.memory_space<vmem>>, %arg9: memref<32x4xf32, #tpu.memory_space<vmem>>, %arg10: memref<1x4xf32, #tpu.memory_space<vmem>>, %arg11: memref<128x4xf32, #tpu.memory_space<vmem>>, %arg12: memref<128x8xf32, #tpu.memory_space<vmem>>) attributes {dimension_semantics = [#tpu.dimension_semantics<parallel>, #tpu.dimension_semantics<arbitrary>], iteration_bounds = array<i64: 1, 1>, scalar_prefetch = 0 : i64, scratch_operands = 1 : i64, tpu.core_type = #tpu.core_type<tc>, window_params = [{transform_indices = @transform_0, window_bounds = array<i64: 128, 128>}, {transform_indices = @transform_1, window_bounds = array<i64: 128, 8>}, {transform_indices = @transform_2, window_bounds = array<i64: 128, 8>}, {transform_indices = @transform_3, window_bounds = array<i64: 128, 1>}, {pipeline_mode = #tpu.pipeline_mode<synchronous>, transform_indices = @transform_4, window_bounds = array<i64: 8, 32>}, {pipeline_mode = #tpu.pipeline_mode<synchronous>, transform_indices = @transform_5, window_bounds = array<i64: 1, 32>}, {pipeline_mode = #tpu.pipeline_mode<synchronous>, transform_indices = @transform_6, window_bounds = array<i64: 8, 32>}, {pipeline_mode = #tpu.pipeline_mode<synchronous>, transform_indices = @transform_7, window_bounds = array<i64: 32, 4>}, {pipeline_mode = #tpu.pipeline_mode<synchronous>, transform_indices = @transform_8, window_bounds = array<i64: 1, 4>}, {transform_indices = @transform_9, window_bounds = array<i64: 128, 4>}]} {
    %c0_i32 = arith.constant 0 : i32
    %0 = arith.cmpi eq, %arg1, %c0_i32 : i32
    %1 = arith.extui %0 : i1 to i32
    %c0_i32_0 = arith.constant 0 : i32
    %2 = arith.cmpi ne, %1, %c0_i32_0 : i32
    scf.if %2 {
      %cst_10 = arith.constant 0.000000e+00 : f32
      %12 = vector.broadcast %cst_10 : f32 to vector<128x8xf32>
      %c0_11 = arith.constant 0 : index
      %c0_12 = arith.constant 0 : index
      %13 = vector.load %arg12[%c0_11, %c0_12] : memref<128x8xf32, #tpu.memory_space<vmem>>, vector<128x8xf32>
      tpu.vector_store %arg12[%c0_11, %c0_12], %12 {strides = array<i32>} : memref<128x8xf32, #tpu.memory_space<vmem>>, vector<128x8xf32>,
    } else {
    }
    %c0 = arith.constant 0 : index
    %c0_1 = arith.constant 0 : index
    %3 = vector.load %arg12[%c0, %c0_1] : memref<128x8xf32, #tpu.memory_space<vmem>>, vector<128x8xf32>
    %c0_2 = arith.constant 0 : index
    %c0_3 = arith.constant 0 : index
    %4 = vector.load %arg2[%c0_2, %c0_3] : memref<128x128xbf16, #tpu.memory_space<vmem>>, vector<128x128xbf16>
    %c0_4 = arith.constant 0 : index
    %c0_5 = arith.constant 0 : index
    %5 = vector.load %arg3[%c0_4, %c0_5] : memref<128x8xbf16, #tpu.memory_space<vmem>>, vector<128x8xbf16>
    %cst = arith.constant dense<0.000000e+00> : vector<128x8xf32>
    %6 = tpu.matmul %4, %5, %cst {dimension_numbers = #tpu.dot_dimension_numbers<[1], [0], [0], [1], [0, 0, 1, 1], [], []>} : vector<128x128xbf16>, vector<128x8xbf16>, vector<128x8xf32> -> vector<128x8xf32>
    %7 = arith.addf %3, %6 : vector<128x8xf32>
    %c0_6 = arith.constant 0 : index
    %c0_7 = arith.constant 0 : index
    %8 = vector.load %arg12[%c0_6, %c0_7] : memref<128x8xf32, #tpu.memory_space<vmem>>, vector<128x8xf32>
    tpu.vector_store %arg12[%c0_6, %c0_7], %7 {strides = array<i32>} : memref<128x8xf32, #tpu.memory_space<vmem>>, vector<128x8xf32>,
    %c0_i32_8 = arith.constant 0 : i32
    %9 = arith.cmpi eq, %arg1, %c0_i32_8 : i32
    %10 = arith.extui %9 : i1 to i32
    %c0_i32_9 = arith.constant 0 : i32
    %11 = arith.cmpi ne, %10, %c0_i32_9 : i32
    scf.if %11 {
      %c0_10 = arith.constant 0 : index
      %c0_11 = arith.constant 0 : index
      %12 = vector.load %arg12[%c0_10, %c0_11] : memref<128x8xf32, #tpu.memory_space<vmem>>, vector<128x8xf32>
      %c0_12 = arith.constant 0 : index
      %c0_13 = arith.constant 0 : index
      %13 = vector.load %arg5[%c0_12, %c0_13] : memref<128x1xf32, #tpu.memory_space<vmem>>, vector<128x1xf32>
      %14 = vector.broadcast %13 : vector<128x1xf32> to vector<128x8xf32>
      %15 = arith.mulf %12, %14 : vector<128x8xf32>
      %c0_14 = arith.constant 0 : index
      %c0_15 = arith.constant 0 : index
      %16 = vector.load %arg4[%c0_14, %c0_15] : memref<128x8xbf16, #tpu.memory_space<vmem>>, vector<128x8xbf16>
      %17 = arith.extf %16 : vector<128x8xbf16> to vector<128x8xf32>
      %c0_16 = arith.constant 0 : index
      %c0_17 = arith.constant 0 : index
      %18 = vector.load %arg6[%c0_16, %c0_17] : memref<8x32xf32, #tpu.memory_space<vmem>>, vector<8x32xf32>
      %cst_18 = arith.constant dense<0.000000e+00> : vector<128x32xf32>
      %19 = tpu.matmul %15, %18, %cst_18 {dimension_numbers = #tpu.dot_dimension_numbers<[1], [0], [0], [1], [0, 0, 1, 1], [], []>} : vector<128x8xf32>, vector<8x32xf32>, vector<128x32xf32> -> vector<128x32xf32>
      %c0_19 = arith.constant 0 : index
      %c0_20 = arith.constant 0 : index
      %20 = vector.load %arg7[%c0_19, %c0_20] : memref<1x32xf32, #tpu.memory_space<vmem>>, vector<1x32xf32>
      %21 = vector.broadcast %20 : vector<1x32xf32> to vector<128x32xf32>
      %22 = arith.addf %19, %21 : vector<128x32xf32>
      %c0_21 = arith.constant 0 : index
      %c0_22 = arith.constant 0 : index
      %23 = vector.load %arg8[%c0_21, %c0_22] : memref<8x32xf32, #tpu.memory_space<vmem>>, vector<8x32xf32>
      %cst_23 = arith.constant dense<0.000000e+00> : vector<128x32xf32>
      %24 = tpu.matmul %17, %23, %cst_23 {dimension_numbers = #tpu.dot_dimension_numbers<[1], [0], [0], [1], [0, 0, 1, 1], [], []>} : vector<128x8xf32>, vector<8x32xf32>, vector<128x32xf32> -> vector<128x32xf32>
      %25 = arith.addf %22, %24 : vector<128x32xf32>
      %cst_24 = arith.constant 0.000000e+00 : f32
      %26 = vector.broadcast %cst_24 : f32 to vector<128x32xf32>
      %27 = arith.maximumf %25, %26 : vector<128x32xf32>
      %c0_25 = arith.constant 0 : index
      %c0_26 = arith.constant 0 : index
      %28 = vector.load %arg9[%c0_25, %c0_26] : memref<32x4xf32, #tpu.memory_space<vmem>>, vector<32x4xf32>
      %cst_27 = arith.constant dense<0.000000e+00> : vector<128x4xf32>
      %29 = tpu.matmul %27, %28, %cst_27 {dimension_numbers = #tpu.dot_dimension_numbers<[1], [0], [0], [1], [0, 0, 1, 1], [], []>} : vector<128x32xf32>, vector<32x4xf32>, vector<128x4xf32> -> vector<128x4xf32>
      %c0_28 = arith.constant 0 : index
      %c0_29 = arith.constant 0 : index
      %30 = vector.load %arg10[%c0_28, %c0_29] : memref<1x4xf32, #tpu.memory_space<vmem>>, vector<1x4xf32>
      %31 = vector.broadcast %30 : vector<1x4xf32> to vector<128x4xf32>
      %32 = arith.addf %29, %31 : vector<128x4xf32>
      %cst_30 = arith.constant dense<0xFF800000> : vector<128xf32>
      %33 = vector.multi_reduction <maximumf>, %32, %cst_30 [1] : vector<128x4xf32> to vector<128xf32>
      %34 = vector.shape_cast %33 : vector<128xf32> to vector<128x1xf32>
      %35 = vector.broadcast %34 : vector<128x1xf32> to vector<128x4xf32>
      %36 = arith.subf %32, %35 : vector<128x4xf32>
      %37 = math.exp %36 : vector<128x4xf32>
      %cst_31 = arith.constant dense<0.000000e+00> : vector<128xf32>
      %38 = vector.multi_reduction <add>, %37, %cst_31 [1] : vector<128x4xf32> to vector<128xf32>
      %39 = vector.shape_cast %38 : vector<128xf32> to vector<128x1xf32>
      %40 = math.log %39 : vector<128x1xf32>
      %41 = vector.broadcast %40 : vector<128x1xf32> to vector<128x4xf32>
      %42 = arith.subf %36, %41 : vector<128x4xf32>
      %c0_32 = arith.constant 0 : index
      %c0_33 = arith.constant 0 : index
      %43 = vector.load %arg11[%c0_32, %c0_33] : memref<128x4xf32, #tpu.memory_space<vmem>>, vector<128x4xf32>
      tpu.vector_store %arg11[%c0_32, %c0_33], %42 {strides = array<i32>} : memref<128x4xf32, #tpu.memory_space<vmem>>, vector<128x4xf32>,
    } else {
    }
    return
  }
  func.func @transform_0(%arg0: i32, %arg1: i32) -> (i32, i32) {
    %c0_i32 = arith.constant 0 : i32
    return %arg0, %arg1 : i32, i32
  }
  func.func @transform_1(%arg0: i32, %arg1: i32) -> (i32, i32) {
    %c0_i32 = arith.constant 0 : i32
    %c0_i32_0 = arith.constant 0 : i32
    return %arg1, %c0_i32 : i32, i32
  }
  func.func @transform_2(%arg0: i32, %arg1: i32) -> (i32, i32) {
    %c0_i32 = arith.constant 0 : i32
    %c0_i32_0 = arith.constant 0 : i32
    return %arg0, %c0_i32 : i32, i32
  }
  func.func @transform_3(%arg0: i32, %arg1: i32) -> (i32, i32) {
    %c0_i32 = arith.constant 0 : i32
    %c0_i32_0 = arith.constant 0 : i32
    return %arg0, %c0_i32 : i32, i32
  }
  func.func @transform_4(%arg0: i32, %arg1: i32) -> (i32, i32) {
    %c0_i32 = arith.constant 0 : i32
    %c0_i32_0 = arith.constant 0 : i32
    %c0_i32_1 = arith.constant 0 : i32
    return %c0_i32, %c0_i32_0 : i32, i32
  }
  func.func @transform_5(%arg0: i32, %arg1: i32) -> (i32, i32) {
    %c0_i32 = arith.constant 0 : i32
    %c0_i32_0 = arith.constant 0 : i32
    %c0_i32_1 = arith.constant 0 : i32
    return %c0_i32, %c0_i32_0 : i32, i32
  }
  func.func @transform_6(%arg0: i32, %arg1: i32) -> (i32, i32) {
    %c0_i32 = arith.constant 0 : i32
    %c0_i32_0 = arith.constant 0 : i32
    %c0_i32_1 = arith.constant 0 : i32
    return %c0_i32, %c0_i32_0 : i32, i32
  }
  func.func @transform_7(%arg0: i32, %arg1: i32) -> (i32, i32) {
    %c0_i32 = arith.constant 0 : i32
    %c0_i32_0 = arith.constant 0 : i32
    %c0_i32_1 = arith.constant 0 : i32
    return %c0_i32, %c0_i32_0 : i32, i32
  }
  func.func @transform_8(%arg0: i32, %arg1: i32) -> (i32, i32) {
    %c0_i32 = arith.constant 0 : i32
    %c0_i32_0 = arith.constant 0 : i32
    %c0_i32_1 = arith.constant 0 : i32
    return %c0_i32, %c0_i32_0 : i32, i32
  }
  func.func @transform_9(%arg0: i32, %arg1: i32) -> (i32, i32) {
    %c0_i32 = arith.constant 0 : i32
    %c0_i32_0 = arith.constant 0 : i32
    return %arg0, %c0_i32 : i32, i32
  }
}

</mosaic_0001>

<bundles_post_ra>
// kernel: tpu_custom_call.1
= control target key start
LH: loop header
LB: loop body
LE: loop exit
PB: predicated region body
PF: predicated region fallthrough
CT: control target
= control target key end

     0   :  { %v1719_v1 = vmov 0   ;;  %vm37_vm0 = vcmask 64512   ;;  %v1720_v18 = vmov 0.0   ;;  %vm929_vm1 = vcmask 261120   ;;  %s2242_s1 = inlined_call_operand.vmem [shape: bf16[128,8], index: 1, kind: input, shape index: {}]   ;;  %s2243_s0 = inlined_call_operand.vmem [shape: bf16[128,128], index: 0, kind: input, shape index: {}]   ;;  %s2244_s3 = inlined_call_operand.vmem [shape: f32[128,1], index: 3, kind: input, shape index: {}]   ;;  %s2245_s4 = inlined_call_operand.vmem [shape: f32[8,32], index: 4, kind: input, shape index: {}]   ;;  %s2246_s6 = inlined_call_operand.vmem [shape: f32[8,32], index: 6, kind: input, shape index: {}]   ;;  %s2247_s2 = inlined_call_operand.vmem [shape: bf16[128,8], index: 2, kind: input, shape index: {}]   ;;  %s2248_s7 = inlined_call_operand.vmem [shape: f32[32,4], index: 7, kind: input, shape index: {}]   ;;  %s2249_s5 = inlined_call_operand.vmem [shape: f32[1,32], index: 5, kind: input, shape index: {}]   ;;  %s2250_s8 = inlined_call_operand.vmem [shape: f32[1,4], index: 8, kind: input, shape index: {}]   ;;  %s2251_s9 = inlined_call_operand.vmem [shape: f32[128,4], index: 9, kind: output, shape index: {}]  }
   0x1   :  { %v1639_v0 = vld [vmem:[%s2242_s1 + $0x38] sm:$0xff]   ;;  %1637 = vset.pattern.permute.xlu0 %v1719_v1  ;;  %1638 = vset.pattern.permute.xlu1 %v1719_v1  ;;  %v1640_v2 = vld [vmem:[%s2242_s1 + $0x30] sm:$0xff]   ;;  %v1641_v3 = vld [vmem:[%s2242_s1 + $0x28] sm:$0xff]   ;;  %40 = vst.msk [vmem:[#allocation2 + $0x10] sm:$0xff] %vm37_vm0, %v1720_v18  ;;  %vm1123_vm2 = vcmask 31744  }
   0x2   :  { %1511 = vmatprep.subr.bf16.mxu0 %v1639_v0  ;;  %v1642_v4 = vld [vmem:[%s2242_s1 + $0x20] sm:$0xff]   ;;  %v1643_v6 = vld [vmem:[%s2242_s1 + $0x18] sm:$0xff]   ;;  %v1644_v7 = vld [vmem:[%s2242_s1 + $0x10] sm:$0xff]   ;;  %38 = vst.msk [vmem:[#allocation2] sm:$0xff] %vm37_vm0, %v1720_v18 }
   0x3   :  { %1512 = vmatpush3.bf16.msra.mxu0 %v1639_v0  ;;  %v1647_v5 = vld [vmem:[%s2243_s0] sm:$0xff]   ;;  %v349_v9 = vld [vmem:[%s2244_s3 + $0x10] sm:$0xff]  ;;  %v348_v10 = vld [vmem:[%s2244_s3 + $0x8] sm:$0xff]  ;;  %39 = vst.msk [vmem:[#allocation2 + $0x8] sm:$0xff] %vm37_vm0, %v1720_v18 }
   0x4   :  { %1513 = vmatprep.subr.bf16.mxu0 %v1640_v2  ;;  %1527 = vmatprep.mubr.bf16.mxu0 %v1647_v5  ;;  %v347_v8 = vld [vmem:[%s2244_s3] sm:$0xff]  ;;  %v350_v11 = vld [vmem:[%s2244_s3 + $0x18] sm:$0xff]  ;;  %v1645_v12 = vld [vmem:[%s2242_s1 + $0x8] sm:$0xff]   ;;  %41 = vst.msk [vmem:[#allocation2 + $0x18] sm:$0xff] %vm37_vm0, %v1720_v18 }
   0x5   :  { %365 = vperm.xlu0 %1637, %v347_v8   ;;  %375 = vperm.xlu1 %1638, %v349_v9   ;;  %v351_v13 = vld [vmem:[%s2244_s3 + $0x20] sm:$0xff]  ;;  %v352_v14 = vld [vmem:[%s2244_s3 + $0x28] sm:$0xff]  ;;  %v353_v16 = vld [vmem:[%s2244_s3 + $0x30] sm:$0xff]  ;;  %42 = vst.msk [vmem:[#allocation2 + $0x20] sm:$0xff] %vm37_vm0, %v1720_v18 }
   0x6   :  { %v1646_v15 = vld [vmem:[%s2242_s1] sm:$0xff]   ;;  %v354_v17 = vld [vmem:[%s2244_s3 + $0x38] sm:$0xff]  ;;  %43 = vst.msk [vmem:[#allocation2 + $0x28] sm:$0xff] %vm37_vm0, %v1720_v18  ;;  %44 = vst.msk [vmem:[#allocation2 + $0x30] sm:$0xff] %vm37_vm0, %v1720_v18 }
   0x7   :  { %1514 = vmatpush3.bf16.msra.mxu0 %v1640_v2  ;;  %45 = vst.msk [vmem:[#allocation2 + $0x38] sm:$0xff] %vm37_vm0, %v1720_v18  ;;  %46 = vst.msk [vmem:[#allocation2 + $0x40] sm:$0xff] %vm37_vm0, %v1720_v18  ;;  %v1648_v19 = vld [vmem:[%s2243_s0 + $0x8] sm:$0xff]   ;;  %v355_v20 = vld [vmem:[%s2244_s3 + $0x40] sm:$0xff] }
   0x8   :  { %1515 = vmatprep.subr.bf16.mxu0 %v1641_v3  ;;  %47 = vst.msk [vmem:[#allocation2 + $0x48] sm:$0xff] %vm37_vm0, %v1720_v18  ;;  %48 = vst.msk [vmem:[#allocation2 + $0x50] sm:$0xff] %vm37_vm0, %v1720_v18  ;;  %v356_v21 = vld [vmem:[%s2244_s3 + $0x48] sm:$0xff]  ;;  %v1649_v22 = vld [vmem:[%s2243_s0 + $0x10] sm:$0xff]  }
   0x9   :  { %370 = vperm.xlu0 %1637, %v348_v10   ;;  %380 = vperm.xlu1 %1638, %v350_v11   ;;  %49 = vst.msk [vmem:[#allocation2 + $0x58] sm:$0xff] %vm37_vm0, %v1720_v18  ;;  %50 = vst.msk [vmem:[#allocation2 + $0x60] sm:$0xff] %vm37_vm0, %v1720_v18  ;;  %v357_v23 = vld [vmem:[%s2244_s3 + $0x50] sm:$0xff]  ;;  %v358_v24 = vld [vmem:[%s2244_s3 + $0x58] sm:$0xff] }
   0xa   :  { %51 = vst.msk [vmem:[#allocation2 + $0x68] sm:$0xff] %vm37_vm0, %v1720_v18  ;;  %52 = vst.msk [vmem:[#allocation2 + $0x70] sm:$0xff] %vm37_vm0, %v1720_v18  ;;  %v1650_v25 = vld [vmem:[%s2243_s0 + $0x18] sm:$0xff]   ;;  %v359_v26 = vld [vmem:[%s2244_s3 + $0x60] sm:$0xff] }
   0xb   :  { %1516 = vmatpush3.bf16.msra.mxu0 %v1641_v3  ;;  %53 = vst.msk [vmem:[#allocation2 + $0x78] sm:$0xff] %vm37_vm0, %v1720_v18  ;;  %v360_v27 = vld [vmem:[%s2244_s3 + $0x68] sm:$0xff]  ;;  %v1651_v28 = vld [vmem:[%s2243_s0 + $0x20] sm:$0xff]   ;;  %v361_v29 = vld [vmem:[%s2244_s3 + $0x70] sm:$0xff] }
   0xc   :  { %1517 = vmatprep.subr.bf16.mxu0 %v1642_v4  ;;  %v362_v30 = vld [vmem:[%s2244_s3 + $0x78] sm:$0xff]  ;;  %v1652_v31 = vld [vmem:[%s2243_s0 + $0x28] sm:$0xff]   ;;  %v1653_v32 = vld [vmem:[%s2243_s0 + $0x30] sm:$0xff]  }
   0xd   :  { %385 = vperm.xlu0 %1637, %v351_v13   ;;  %390 = vperm.xlu1 %1638, %v352_v14   ;;  %v1654_v33 = vld [vmem:[%s2243_s0 + $0x38] sm:$0xff]   ;;  %v491_v34 = vld [vmem:[%s2245_s4] sm:$0xff]  ;;  %v56_v36 = vld [vmem:[#allocation2 + $0x10] sm:$0xff] }
   0xe   :  { %1543 = vmatprep.subr.mxu1 %v491_v34  ;;  %v692_v35 = vld [vmem:[%s2246_s6] sm:$0xff]  ;;  %v57_v43 = vld [vmem:[#allocation2 + $0x18] sm:$0xff]  ;;  %v55_v46 = vld [vmem:[#allocation2 + $0x8] sm:$0xff] }
   0xf   :  { %1518 = vmatpush3.bf16.msra.mxu0 %v1642_v4  ;;  %1544 = vmatpush3.msra.mxu1 %v491_v34  ;;  %v54_v39 = vld [vmem:[#allocation2] sm:$0xff]  ;;  %v60_v50 = vld [vmem:[#allocation2 + $0x30] sm:$0xff]  ;;  %v61_v57 = vld [vmem:[#allocation2 + $0x38] sm:$0xff] }
  0x10   :  { %1519 = vmatprep.subr.bf16.mxu0 %v1643_v6  ;;  %1569 = vmatprep.subr.mxu1 %v692_v35  ;;  %v58_v54 = vld [vmem:[#allocation2 + $0x20] sm:$0xff]  ;;  %v59_v61 = vld [vmem:[#allocation2 + $0x28] sm:$0xff]  ;;  %v64_v3 = vld [vmem:[#allocation2 + $0x50] sm:$0xff] }
  0x11   :  { %395 = vperm.xlu0 %1637, %v353_v16   ;;  %400 = vperm.xlu1 %1638, %v354_v17   ;;  %v65_v13 = vld [vmem:[#allocation2 + $0x58] sm:$0xff] }
  0x13   :  { %1520 = vmatpush3.bf16.msra.mxu0 %v1643_v6 }
  0x14   :  { %1521 = vmatprep.subr.bf16.mxu0 %v1644_v7 }
  0x15   :  { %405 = vperm.xlu0 %1637, %v355_v20   ;;  %410 = vperm.xlu1 %1638, %v356_v21  }
  0x17   :  { %1522 = vmatpush3.bf16.msra.mxu0 %v1644_v7  ;;  %v62_v7 = vld [vmem:[#allocation2 + $0x40] sm:$0xff] }
  0x18   :  { %1523 = vmatprep.subr.bf16.mxu0 %v1645_v12 }
  0x19   :  { %415 = vperm.xlu0 %1637, %v357_v23   ;;  %420 = vperm.xlu1 %1638, %v358_v24  }
  0x1b   :  { %1524 = vmatpush3.bf16.msra.mxu0 %v1645_v12 }
  0x1c   :  { %1525 = vmatprep.subr.bf16.mxu0 %v1646_v15 }
  0x1d   :  { %425 = vperm.xlu0 %1637, %v359_v26   ;;  %430 = vperm.xlu1 %1638, %v360_v27  }
  0x1f   :  { %1526 = vmatpush3.bf16.msra.mxu0 %v1646_v15 }
  0x21   :  { %435 = vperm.xlu0 %1637, %v361_v29   ;;  %440 = vperm.xlu1 %1638, %v362_v30   ;;  %v66_v30 = vld [vmem:[#allocation2 + $0x60] sm:$0xff] }
  0x22   :  { %1528 = vmatmul.mubr.bf16.vlgmr.msra.gmra.mxu0 %v1648_v19  ;;  %v63_v19 = vld [vmem:[#allocation2 + $0x48] sm:$0xff] }
  0x23   :  { %1531 = vmatprep.mubr.bf16.mxu0 %v1649_v22 }
  0x2a   :  { %1532 = vmatmul.mubr.bf16.gmra.mxu0 %v1650_v25  ;;  %v68_v25 = vld [vmem:[#allocation2 + $0x70] sm:$0xff] }
  0x2b   :  { %1535 = vmatprep.mubr.bf16.mxu0 %v1651_v28 }
  0x32   :  { %1536 = vmatmul.mubr.bf16.gmra.mxu0 %v1652_v31 }
  0x33   :  { %1539 = vmatprep.mubr.bf16.mxu0 %v1653_v32 }
  0x3a   :  { %1540 = vmatmul.mubr.bf16.gmra.mxu0 %v1654_v33 }
  0x80   :  { %v366_v37 = vpop.permute.xlu0 %365  ;;  %v376_v41 = vpop.permute.xlu1 %375 }
  0x84   :  { %v371_v47 = vpop.permute.xlu0 %370  ;;  %v381_v52 = vpop.permute.xlu1 %380 }
  0x88   :  { %v386_v58 = vpop.permute.xlu0 %385  ;;  %v391_v1 = vpop.permute.xlu1 %390 }
  0x8c   :  { %v396_v9 = vpop.permute.xlu0 %395  ;;  %v401_v17 = vpop.permute.xlu1 %400 }
  0x90   :  { %v406_v26 = vpop.permute.xlu0 %405  ;;  %v411_v34 = vpop.permute.xlu1 %410 }
  0xe2   :  { %v1529_v38 = vpop.f32.mrf.mxu0 }
  0xe3   :  { %v297_v40 = vadd.f32 %v1529_v38, %v56_v36  ;;  %v69_v36 = vld [vmem:[#allocation2 + $0x78] sm:$0xff] }
  0xe4   :  { %v232_v42 = vpop.f32.mrf.mxu0 }
  0xe5   :  { %314 = vst.msk [vmem:[#allocation2 + $0x10] sm:$0xff] %vm37_vm0, %v297_v40  ;;  %v295_v44 = vadd.f32 %v232_v42, %v54_v39 }
  0xe6   :  { %v1530_v45 = vpop.f32.mrf.mxu0 }
  0xe7   :  { %312 = vst.msk [vmem:[#allocation2] sm:$0xff] %vm37_vm0, %v295_v44  ;;  %v298_v48 = vadd.f32 %v1530_v45, %v57_v43  ;;  %v416_v43 = vpop.permute.xlu0 %415 }
  0xe8   :  { %v235_v49 = vpop.f32.mrf.mxu0 }
  0xe9   :  { %315 = vst.msk [vmem:[#allocation2 + $0x18] sm:$0xff] %vm37_vm0, %v298_v48  ;;  %v296_v51 = vadd.f32 %v235_v49, %v55_v46 }
  0xea   :  { %v1533_v53 = vpop.f32.mrf.mxu0 }
  0xeb   :  { %313 = vst.msk [vmem:[#allocation2 + $0x8] sm:$0xff] %vm37_vm0, %v296_v51  ;;  %v301_v55 = vadd.f32 %v1533_v53, %v60_v50  ;;  %v421_v50 = vpop.permute.xlu1 %420 }
  0xec   :  { %v248_v56 = vpop.f32.mrf.mxu0  ;;  %v333_v5 = vld [vmem:[#allocation2 + $0x10] sm:$0xff] }
  0xed   :  { %318 = vst.msk [vmem:[#allocation2 + $0x30] sm:$0xff] %vm37_vm0, %v301_v55  ;;  %v299_v59 = vadd.f32 %v248_v56, %v58_v54  ;;  %v445_v14 = vmul.f32 %v376_v41, %v333_v5  ;;  %v67_v41 = vld [vmem:[#allocation2 + $0x68] sm:$0xff]  ;;  %v426_v55 = vpop.permute.xlu0 %425 }
  0xee   :  { %v1534_v60 = vpop.f32.mrf.mxu0  ;;  %v331_v62 = vld [vmem:[#allocation2] sm:$0xff] }
  0xef   :  { %316 = vst.msk [vmem:[#allocation2 + $0x20] sm:$0xff] %vm37_vm0, %v299_v59  ;;  %v302_v63 = vadd.f32 %v1534_v60, %v61_v57  ;;  %v443_v0 = vmul.f32 %v366_v37, %v331_v62  ;;  %v431_v59 = vpop.permute.xlu1 %430 }
  0xf0   :  { %v251_v2 = vpop.f32.mrf.mxu0  ;;  %v334_v15 = vld [vmem:[#allocation2 + $0x18] sm:$0xff] }
  0xf1   :  { %319 = vst.msk [vmem:[#allocation2 + $0x38] sm:$0xff] %vm37_vm0, %v302_v63  ;;  %v300_v4 = vadd.f32 %v251_v2, %v59_v61  ;;  %1545 = vmatprep.mubr.msk.f32.mxu1 %vm37_vm0, %v443_v0  ;;  %v446_v22 = vmul.f32 %v381_v52, %v334_v15  ;;  %v436_v62 = vpop.permute.xlu0 %435  ;;  %v1403_v0 = vld [vmem:[%s2247_s2] sm:$0xff]  }
  0xf2   :  { %v1537_v6 = vpop.f32.mrf.mxu0  ;;  %v332_v8 = vld [vmem:[#allocation2 + $0x8] sm:$0xff]  ;;  %v1437_v15 = vld [vmem:[%s2247_s2 + $0x20] sm:$0xff]  }
  0xf3   :  { %317 = vst.msk [vmem:[#allocation2 + $0x28] sm:$0xff] %vm37_vm0, %v300_v4  ;;  %v305_v10 = vadd.f32 %v1537_v6, %v64_v3  ;;  %v444_v11 = vmul.f32 %v371_v47, %v332_v8  ;;  %v441_v3 = vpop.permute.xlu1 %440  ;;  %v1404_v4 = vunpack.c.l.bf16 %v1403_v0  ;;  %v1434_v6 = vld [vmem:[%s2247_s2 + $0x8] sm:$0xff]  }
  0xf4   :  { %v264_v12 = vpop.f32.mrf.mxu0  ;;  %v337_v28 = vld [vmem:[#allocation2 + $0x30] sm:$0xff]  ;;  %v1408_v8 = vunpack.c.l.bf16 %v1434_v6 }
  0xf5   :  { %322 = vst.msk [vmem:[#allocation2 + $0x50] sm:$0xff] %vm37_vm0, %v305_v10  ;;  %v303_v16 = vadd.f32 %v264_v12, %v62_v7  ;;  %1546 = vmatmul.mubr.msk.f32.vlgmr.msra.gmra.mxu1 %vm37_vm0, %v444_v11  ;;  %v449_v37 = vmul.f32 %v396_v9, %v337_v28  ;;  %v1405_v7 = vunpack.c.h.bf16 %v1403_v0  ;;  %v1435_v9 = vld [vmem:[%s2247_s2 + $0x10] sm:$0xff]   ;;  %v1409_v10 = vunpack.c.h.bf16 %v1434_v6  ;;  %v1436_v12 = vld [vmem:[%s2247_s2 + $0x18] sm:$0xff]  }
  0xf6   :  { %1570 = vmatpush3.msra.mxu1 %v692_v35  ;;  %v1538_v18 = vpop.f32.mrf.mxu0  ;;  %1548 = vmatprep.mubr.msk.f32.mxu1 %vm37_vm0, %v445_v14  ;;  %v335_v20 = vld [vmem:[#allocation2 + $0x20] sm:$0xff]  ;;  %v1412_v11 = vunpack.c.l.bf16 %v1435_v9  ;;  %v1416_v14 = vunpack.c.l.bf16 %v1436_v12  ;;  %v921_v28 = vld [vmem:[%s2248_s7 + $0x18] sm:$0xff] }
  0xf7   :  { %320 = vst.msk [vmem:[#allocation2 + $0x40] sm:$0xff] %vm37_vm0, %v303_v16  ;;  %v306_v21 = vadd.f32 %v1538_v18, %v65_v13  ;;  %v447_v23 = vmul.f32 %v386_v58, %v335_v20  ;;  %v1413_v13 = vunpack.c.h.bf16 %v1435_v9  ;;  %v1417_v16 = vunpack.c.h.bf16 %v1436_v12  ;;  %v1438_v18 = vld [vmem:[%s2247_s2 + $0x28] sm:$0xff]   ;;  %1595 = vmatprep.subr.mxu0 %v921_v28  ;;  %1627 = vmatprep.subr.mxu1 %v921_v28 }
  0xf8   :  { %v267_v24 = vpop.f32.mrf.mxu0  ;;  %v338_v38 = vld [vmem:[#allocation2 + $0x38] sm:$0xff]  ;;  %v1424_v20 = vunpack.c.l.bf16 %v1438_v18  ;;  %1596 = vmatpush3.msra.mxu0 %v921_v28 }
  0xf9   :  { %323 = vst.msk [vmem:[#allocation2 + $0x58] sm:$0xff] %vm37_vm0, %v306_v21  ;;  %v304_v27 = vadd.f32 %v267_v24, %v63_v19  ;;  %1549 = vmatmul.mubr.msk.f32.gmra.mxu1 %vm37_vm0, %v446_v22  ;;  %v450_v45 = vmul.f32 %v401_v17, %v338_v38  ;;  %v1420_v17 = vunpack.c.l.bf16 %v1437_v15  ;;  %v1421_v19 = vunpack.c.h.bf16 %v1437_v15  ;;  %v1439_v21 = vld [vmem:[%s2247_s2 + $0x30] sm:$0xff]   ;;  %v1440_v24 = vld [vmem:[%s2247_s2 + $0x38] sm:$0xff]  }
  0xfa   :  { %v1541_v29 = vpop.f32.mrf.mxu0  ;;  %1551 = vmatprep.mubr.msk.f32.mxu1 %vm37_vm0, %v447_v23  ;;  %v336_v31 = vld [vmem:[#allocation2 + $0x28] sm:$0xff]  ;;  %v1425_v22 = vunpack.c.h.bf16 %v1438_v18  ;;  %v1428_v23 = vunpack.c.l.bf16 %v1439_v21 }
  0xfb   :  { %321 = vst.msk [vmem:[#allocation2 + $0x48] sm:$0xff] %vm37_vm0, %v304_v27  ;;  %v309_v32 = vadd.f32 %v1541_v29, %v68_v25  ;;  %v448_v33 = vmul.f32 %v391_v1, %v336_v31  ;;  %v1429_v25 = vunpack.c.h.bf16 %v1439_v21  ;;  %v1433_v27 = vunpack.c.h.bf16 %v1440_v24  ;;  %v920_v29 = vld [vmem:[%s2248_s7 + $0x10] sm:$0xff]  ;;  %v918_v31 = vld [vmem:[%s2248_s7] sm:$0xff] }
  0xfc   :  { %v280_v35 = vpop.f32.mrf.mxu0  ;;  %v341_v49 = vld [vmem:[#allocation2 + $0x50] sm:$0xff]  ;;  %1597 = vmatprep.subr.mxu0 %v920_v29 }
  0xfd   :  { %326 = vst.msk [vmem:[#allocation2 + $0x70] sm:$0xff] %vm37_vm0, %v309_v32  ;;  %v307_v39 = vadd.f32 %v280_v35, %v66_v30  ;;  %1552 = vmatmul.mubr.msk.f32.gmra.mxu1 %vm37_vm0, %v448_v33  ;;  %v453_v53 = vmul.f32 %v416_v43, %v341_v49  ;;  %1598 = vmatpush3.msra.mxu0 %v920_v29  ;;  %v919_v30 = vld [vmem:[%s2248_s7 + $0x8] sm:$0xff] }
  0xfe   :  { %v1542_v40 = vpop.f32.mrf.mxu0  ;;  %1554 = vmatprep.mubr.msk.f32.mxu1 %vm37_vm0, %v449_v37  ;;  %v339_v42 = vld [vmem:[#allocation2 + $0x40] sm:$0xff]  ;;  %1599 = vmatprep.subr.mxu0 %v919_v30 }
  0xff   :  { %324 = vst.msk [vmem:[#allocation2 + $0x60] sm:$0xff] %vm37_vm0, %v307_v39  ;;  %v310_v44 = vadd.f32 %v1542_v40, %v69_v36  ;;  %v451_v46 = vmul.f32 %v406_v26, %v339_v42  ;;  %v1432_v26 = vunpack.c.l.bf16 %v1440_v24  ;;  %1600 = vmatpush3.msra.mxu0 %v919_v30 }
 0x100   :  { %v283_v47 = vpop.f32.mrf.mxu0  ;;  %v342_v54 = vld [vmem:[#allocation2 + $0x58] sm:$0xff]  ;;  %1601 = vmatprep.subr.mxu0 %v918_v31 }
 0x101   :  { %327 = vst.msk [vmem:[#allocation2 + $0x78] sm:$0xff] %vm37_vm0, %v310_v44  ;;  %v308_v48 = vadd.f32 %v283_v47, %v67_v41  ;;  %1555 = vmatmul.mubr.msk.f32.gmra.mxu1 %vm37_vm0, %v450_v45  ;;  %v454_v57 = vmul.f32 %v421_v50, %v342_v54  ;;  %1602 = vmatpush3.msra.mxu0 %v918_v31  ;;  %v1980_v47 = vld [vmem:[%s2249_s5] ss:$0 sm:$0xff] }
 0x102   :  { %1557 = vmatprep.mubr.msk.f32.mxu1 %vm37_vm0, %v451_v46  ;;  %v340_v51 = vld [vmem:[#allocation2 + $0x48] sm:$0xff] }
 0x103   :  { %325 = vst.msk [vmem:[#allocation2 + $0x68] sm:$0xff] %vm37_vm0, %v308_v48  ;;  %v452_v52 = vmul.f32 %v411_v34, %v340_v51 }
 0x104   :  { %v345_v60 = vld [vmem:[#allocation2 + $0x70] sm:$0xff] }
 0x105   :  { %1558 = vmatmul.mubr.msk.f32.gmra.mxu1 %vm37_vm0, %v452_v52  ;;  %v457_v1 = vmul.f32 %v436_v62, %v345_v60 }
 0x106   :  { %1560 = vmatprep.mubr.msk.f32.mxu1 %vm37_vm0, %v453_v53  ;;  %v343_v56 = vld [vmem:[#allocation2 + $0x60] sm:$0xff] }
 0x107   :  { %v455_v58 = vmul.f32 %v426_v55, %v343_v56 }
 0x108   :  { %v346_v2 = vld [vmem:[#allocation2 + $0x78] sm:$0xff] }
 0x109   :  { %1561 = vmatmul.mubr.msk.f32.gmra.mxu1 %vm37_vm0, %v454_v57  ;;  %v458_v5 = vmul.f32 %v441_v3, %v346_v2 }
 0x10a   :  { %1563 = vmatprep.mubr.msk.f32.mxu1 %vm37_vm0, %v455_v58  ;;  %v344_v61 = vld [vmem:[#allocation2 + $0x68] sm:$0xff] }
 0x10b   :  { %v456_v63 = vmul.f32 %v431_v59, %v344_v61 }
 0x10d   :  { %1564 = vmatmul.mubr.msk.f32.gmra.mxu1 %vm37_vm0, %v456_v63 }
 0x10e   :  { %1566 = vmatprep.mubr.msk.f32.mxu1 %vm37_vm0, %v457_v1 }
 0x111   :  { %1567 = vmatmul.mubr.msk.f32.gmra.mxu1 %vm37_vm0, %v458_v5 }
 0x112   :  { %1571 = vmatprep.mubr.msk.f32.mxu1 %vm37_vm0, %v1404_v4 }
 0x115   :  { %1572 = vmatmul.mubr.msk.f32.vlgmr.msra.gmra.mxu1 %vm37_vm0, %v1405_v7 }
 0x116   :  { %1574 = vmatprep.mubr.msk.f32.mxu1 %vm37_vm0, %v1408_v8  ;;  %1631 = vmatpush3.msra.mxu1 %v921_v28 }
 0x117   :  { %1628 = vmatprep.subr.mxu1 %v920_v29 }
 0x118   :  { %1632 = vmatpush3.msra.mxu1 %v920_v29 }
 0x119   :  { %1575 = vmatmul.mubr.msk.f32.gmra.mxu1 %vm37_vm0, %v1409_v10  ;;  %1629 = vmatprep.subr.mxu1 %v919_v30 }
 0x11a   :  { %1577 = vmatprep.mubr.msk.f32.mxu1 %vm37_vm0, %v1412_v11  ;;  %1633 = vmatpush3.msra.mxu1 %v919_v30 }
 0x11b   :  { %1630 = vmatprep.subr.mxu1 %v918_v31 }
 0x11c   :  { %1634 = vmatpush3.msra.mxu1 %v918_v31 }
 0x11d   :  { %1578 = vmatmul.mubr.msk.f32.gmra.mxu1 %vm37_vm0, %v1413_v13 }
 0x11e   :  { %1580 = vmatprep.mubr.msk.f32.mxu1 %vm37_vm0, %v1416_v14 }
 0x121   :  { %1581 = vmatmul.mubr.msk.f32.gmra.mxu1 %vm37_vm0, %v1417_v16 }
 0x122   :  { %1583 = vmatprep.mubr.msk.f32.mxu1 %vm37_vm0, %v1420_v17 }
 0x125   :  { %1584 = vmatmul.mubr.msk.f32.gmra.mxu1 %vm37_vm0, %v1421_v19 }
 0x126   :  { %1586 = vmatprep.mubr.msk.f32.mxu1 %vm37_vm0, %v1424_v20 }
 0x129   :  { %1587 = vmatmul.mubr.msk.f32.gmra.mxu1 %vm37_vm0, %v1425_v22 }
 0x12a   :  { %1589 = vmatprep.mubr.msk.f32.mxu1 %vm37_vm0, %v1428_v23 }
 0x12d   :  { %1590 = vmatmul.mubr.msk.f32.gmra.mxu1 %vm37_vm0, %v1429_v25 }
 0x12e   :  { %1592 = vmatprep.mubr.msk.f32.mxu1 %vm37_vm0, %v1432_v26 }
 0x131   :  { %1593 = vmatmul.mubr.msk.f32.gmra.mxu1 %vm37_vm0, %v1433_v27 }
 0x1b5   :  { %v1547_v32 = vpop.f32.mrf.mxu1 }
 0x1b6   :  { %v619_v49 = vadd.f32 %v1547_v32, %v1980_v47 }
 0x1b7   :  { %v613_v33 = vpop.f32.mrf.mxu1 }
 0x1b8   :  { %v614_v51 = vadd.f32 %v1980_v47, %v613_v33 }
 0x1b9   :  { %v1550_v34 = vpop.f32.mrf.mxu1 }
 0x1ba   :  { %v629_v55 = vadd.f32 %v1550_v34, %v1980_v47 }
 0x1bb   :  { %v623_v35 = vpop.f32.mrf.mxu1 }
 0x1bc   :  { %v624_v57 = vadd.f32 %v1980_v47, %v623_v35 }
 0x1bd   :  { %v1553_v36 = vpop.f32.mrf.mxu1 }
 0x1be   :  { %v639_v63 = vadd.f32 %v1553_v36, %v1980_v47 }
 0x1bf   :  { %v633_v37 = vpop.f32.mrf.mxu1 }
 0x1c0   :  { %v634_v1 = vadd.f32 %v1980_v47, %v633_v37 }
 0x1c1   :  { %v1556_v38 = vpop.f32.mrf.mxu1 }
 0x1c2   :  { %v649_v7 = vadd.f32 %v1556_v38, %v1980_v47 }
 0x1c3   :  { %v643_v39 = vpop.f32.mrf.mxu1 }
 0x1c4   :  { %v644_v9 = vadd.f32 %v1980_v47, %v643_v39 }
 0x1c5   :  { %v1559_v40 = vpop.f32.mrf.mxu1 }
 0x1c6   :  { %v659_v15 = vadd.f32 %v1559_v40, %v1980_v47 }
 0x1c7   :  { %v653_v41 = vpop.f32.mrf.mxu1 }
 0x1c8   :  { %v654_v17 = vadd.f32 %v1980_v47, %v653_v41 }
 0x1c9   :  { %v1562_v42 = vpop.f32.mrf.mxu1 }
 0x1ca   :  { %v669_v23 = vadd.f32 %v1562_v42, %v1980_v47 }
 0x1cb   :  { %v663_v43 = vpop.f32.mrf.mxu1 }
 0x1cc   :  { %v664_v25 = vadd.f32 %v1980_v47, %v663_v43 }
 0x1cd   :  { %v1565_v44 = vpop.f32.mrf.mxu1 }
 0x1ce   :  { %v679_v31 = vadd.f32 %v1565_v44, %v1980_v47 }
 0x1cf   :  { %v1973_v45 = vpop.f32.mrf.mxu1 }
 0x1d0   :  { %v674_v33 = vadd.f32 %v1980_v47, %v1973_v45 }
 0x1d1   :  { %v1975_v46 = vpop.f32.mrf.mxu1 }
 0x1d2   :  { %v689_v39 = vadd.f32 %v1975_v46, %v1980_v47  ;;  %v1385_v46 = vld [vmem:[%s2250_s8] ss:$0 sm:$0xff] }
 0x1d3   :  { %v1982_v48 = vpop.f32.mrf.mxu1 }
 0x1d4   :  { %v684_v41 = vadd.f32 %v1980_v47, %v1982_v48 }
 0x1d5   :  { %v1573_v50 = vpop.f32.mrf.mxu1 }
 0x1d6   :  { %v887_v52 = vadd.f32 %v1573_v50, %v619_v49 }
 0x1d7   :  { %v807_v53 = vpop.f32.mrf.mxu1 }
 0x1d8   :  { %v886_v54 = vadd.f32 %v807_v53, %v614_v51  ;;  %v903_v59 = vmax.f32 %v887_v52, 0.0 }
 0x1d9   :  { %v1576_v56 = vpop.f32.mrf.mxu1 }
 0x1da   :  { %v902_v58 = vmax.f32 %v886_v54, 0.0  ;;  %v889_v60 = vadd.f32 %v1576_v56, %v629_v55 }
 0x1db   :  { %v817_v61 = vpop.f32.mrf.mxu1 }
 0x1dc   :  { %v888_v62 = vadd.f32 %v817_v61, %v624_v57  ;;  %1603 = vmatprep.mubr.msk.f32.mxu0 %vm929_vm1, %v902_v58  ;;  %v905_v3 = vmax.f32 %v889_v60, 0.0 }
 0x1dd   :  { %v1579_v0 = vpop.f32.mrf.mxu1  ;;  %1604 = vmatmul.mubr.msk.f32.vlgmr.msra.gmra.mxu0 %vm929_vm1, %v903_v59 }
 0x1de   :  { %v904_v2 = vmax.f32 %v888_v62, 0.0  ;;  %v891_v4 = vadd.f32 %v1579_v0, %v639_v63 }
 0x1df   :  { %v827_v5 = vpop.f32.mrf.mxu1 }
 0x1e0   :  { %v890_v6 = vadd.f32 %v827_v5, %v634_v1  ;;  %1606 = vmatprep.mubr.msk.f32.mxu0 %vm929_vm1, %v904_v2  ;;  %v907_v11 = vmax.f32 %v891_v4, 0.0 }
 0x1e1   :  { %v1582_v8 = vpop.f32.mrf.mxu1  ;;  %1607 = vmatmul.mubr.msk.f32.gmra.mxu0 %vm929_vm1, %v905_v3 }
 0x1e2   :  { %v906_v10 = vmax.f32 %v890_v6, 0.0  ;;  %v893_v12 = vadd.f32 %v1582_v8, %v649_v7 }
 0x1e3   :  { %v837_v13 = vpop.f32.mrf.mxu1 }
 0x1e4   :  { %v892_v14 = vadd.f32 %v837_v13, %v644_v9  ;;  %1609 = vmatprep.mubr.msk.f32.mxu0 %vm929_vm1, %v906_v10  ;;  %v909_v19 = vmax.f32 %v893_v12, 0.0 }
 0x1e5   :  { %v1585_v16 = vpop.f32.mrf.mxu1  ;;  %1610 = vmatmul.mubr.msk.f32.gmra.mxu0 %vm929_vm1, %v907_v11 }
 0x1e6   :  { %v908_v18 = vmax.f32 %v892_v14, 0.0  ;;  %v895_v20 = vadd.f32 %v1585_v16, %v659_v15 }
 0x1e7   :  { %v847_v21 = vpop.f32.mrf.mxu1 }
 0x1e8   :  { %v894_v22 = vadd.f32 %v847_v21, %v654_v17  ;;  %1612 = vmatprep.mubr.msk.f32.mxu0 %vm929_vm1, %v908_v18  ;;  %v911_v27 = vmax.f32 %v895_v20, 0.0 }
 0x1e9   :  { %v1588_v24 = vpop.f32.mrf.mxu1  ;;  %1613 = vmatmul.mubr.msk.f32.gmra.mxu0 %vm929_vm1, %v909_v19 }
 0x1ea   :  { %v910_v26 = vmax.f32 %v894_v22, 0.0  ;;  %v897_v28 = vadd.f32 %v1588_v24, %v669_v23 }
 0x1eb   :  { %v857_v29 = vpop.f32.mrf.mxu1 }
 0x1ec   :  { %v896_v30 = vadd.f32 %v857_v29, %v664_v25  ;;  %1615 = vmatprep.mubr.msk.f32.mxu0 %vm929_vm1, %v910_v26  ;;  %v913_v35 = vmax.f32 %v897_v28, 0.0 }
 0x1ed   :  { %v1591_v32 = vpop.f32.mrf.mxu1  ;;  %1616 = vmatmul.mubr.msk.f32.gmra.mxu0 %vm929_vm1, %v911_v27 }
 0x1ee   :  { %v912_v34 = vmax.f32 %v896_v30, 0.0  ;;  %v899_v36 = vadd.f32 %v1591_v32, %v679_v31 }
 0x1ef   :  { %v867_v37 = vpop.f32.mrf.mxu1 }
 0x1f0   :  { %v898_v38 = vadd.f32 %v867_v37, %v674_v33  ;;  %1618 = vmatprep.mubr.msk.f32.mxu1 %vm929_vm1, %v912_v34  ;;  %v915_v43 = vmax.f32 %v899_v36, 0.0 }
 0x1f1   :  { %v1594_v40 = vpop.f32.mrf.mxu1  ;;  %1619 = vmatmul.mubr.msk.f32.vlgmr.msra.gmra.mxu1 %vm929_vm1, %v913_v35 }
 0x1f2   :  { %v914_v42 = vmax.f32 %v898_v38, 0.0  ;;  %v901_v44 = vadd.f32 %v1594_v40, %v689_v39 }
 0x1f3   :  { %v877_v45 = vpop.f32.mrf.mxu1 }
 0x1f4   :  { %v900_v49 = vadd.f32 %v877_v45, %v684_v41  ;;  %1621 = vmatprep.mubr.msk.f32.mxu1 %vm929_vm1, %v914_v42  ;;  %v917_v51 = vmax.f32 %v901_v44, 0.0 }
 0x1f5   :  { %1622 = vmatmul.mubr.msk.f32.gmra.mxu1 %vm929_vm1, %v915_v43 }
 0x1f6   :  { %v916_v50 = vmax.f32 %v900_v49, 0.0 }
 0x1f8   :  { %1624 = vmatprep.mubr.msk.f32.mxu1 %vm929_vm1, %v916_v50 }
 0x1f9   :  { %1625 = vmatmul.mubr.msk.f32.gmra.mxu1 %vm929_vm1, %v917_v51 }
 0x29d   :  { %v1605_v47 = vpop.f32.mrf.mxu0 }
 0x29e   :  { %v2022_v48 = vadd.f32 %v1605_v47, %v1385_v46 }
 0x29f   :  { %v1044_v52 = vpop.f32.mrf.mxu0 }
 0x2a0   :  { %v2024_v53 = vadd.f32 %v1385_v46, %v1044_v52  ;;  %v1127_v54 = vsel %vm1123_vm2, %v2022_v48, -inf }
 0x2a1   :  { %1128 = vmax.xlane.f32.xlu1 %v1127_v54  ;;  %v1608_v55 = vpop.f32.mrf.mxu0 }
 0x2a2   :  { %v2028_v56 = vadd.f32 %v1608_v55, %v1385_v46  ;;  %v1124_v57 = vsel %vm1123_vm2, %v2024_v53, -inf }
 0x2a3   :  { %1125 = vmax.xlane.f32.xlu0 %v1124_v57  ;;  %v1054_v58 = vpop.f32.mrf.mxu0 }
 0x2a4   :  { %v2032_v60 = vadd.f32 %v1385_v46, %v1054_v58  ;;  %v1133_v61 = vsel %vm1123_vm2, %v2028_v56, -inf }
 0x2a5   :  { %v1611_v59 = vpop.f32.mrf.mxu0 }
 0x2a6   :  { %v2038_v1 = vadd.f32 %v1611_v59, %v1385_v46  ;;  %v1130_v2 = vsel %vm1123_vm2, %v2032_v60, -inf }
 0x2a7   :  { %1134 = vmax.xlane.f32.xlu0 %v1133_v61  ;;  %v1064_v62 = vpop.f32.mrf.mxu0 }
 0x2a8   :  { %v2036_v63 = vadd.f32 %v1385_v46, %v1064_v62  ;;  %v1139_v8 = vsel %vm1123_vm2, %v2038_v1, -inf }
 0x2a9   :  { %v1614_v0 = vpop.f32.mrf.mxu0 }
 0x2aa   :  { %v1136_v3 = vsel %vm1123_vm2, %v2036_v63, -inf  ;;  %v2044_v7 = vadd.f32 %v1614_v0, %v1385_v46 }
 0x2ab   :  { %1131 = vmax.xlane.f32.xlu0 %v1130_v2  ;;  %1137 = vmax.xlane.f32.xlu1 %v1136_v3  ;;  %v1074_v4 = vpop.f32.mrf.mxu0 }
 0x2ac   :  { %v1075_v5 = vadd.f32 %v1385_v46, %v1074_v4  ;;  %v1145_v14 = vsel %vm1123_vm2, %v2044_v7, -inf }
 0x2ad   :  { %v1617_v6 = vpop.f32.mrf.mxu0 }
 0x2ae   :  { %v1142_v9 = vsel %vm1123_vm2, %v1075_v5, -inf  ;;  %v2051_v13 = vadd.f32 %v1617_v6, %v1385_v46 }
 0x2af   :  { %1140 = vmax.xlane.f32.xlu0 %v1139_v8  ;;  %1143 = vmax.xlane.f32.xlu1 %v1142_v9  ;;  %v1084_v10 = vpop.f32.mrf.mxu0 }
 0x2b0   :  { %v2049_v11 = vadd.f32 %v1385_v46, %v1084_v10  ;;  %v1151_v20 = vsel %vm1123_vm2, %v2051_v13, -inf }
 0x2b1   :  { %v1620_v12 = vpop.f32.mrf.mxu1 }
 0x2b2   :  { %v1148_v15 = vsel %vm1123_vm2, %v2049_v11, -inf  ;;  %v2059_v19 = vadd.f32 %v1620_v12, %v1385_v46 }
 0x2b3   :  { %1146 = vmax.xlane.f32.xlu0 %v1145_v14  ;;  %1149 = vmax.xlane.f32.xlu1 %v1148_v15  ;;  %v1094_v16 = vpop.f32.mrf.mxu1 }
 0x2b4   :  { %v2057_v17 = vadd.f32 %v1385_v46, %v1094_v16  ;;  %v1157_v26 = vsel %vm1123_vm2, %v2059_v19, -inf }
 0x2b5   :  { %v1623_v18 = vpop.f32.mrf.mxu1 }
 0x2b6   :  { %v1154_v21 = vsel %vm1123_vm2, %v2057_v17, -inf  ;;  %v2067_v25 = vadd.f32 %v1623_v18, %v1385_v46 }
 0x2b7   :  { %1152 = vmax.xlane.f32.xlu0 %v1151_v20  ;;  %1155 = vmax.xlane.f32.xlu1 %v1154_v21  ;;  %v1104_v22 = vpop.f32.mrf.mxu1 }
 0x2b8   :  { %v2065_v23 = vadd.f32 %v1385_v46, %v1104_v22  ;;  %v1163_v31 = vsel %vm1123_vm2, %v2067_v25, -inf }
 0x2b9   :  { %v1626_v24 = vpop.f32.mrf.mxu1 }
 0x2ba   :  { %v1160_v27 = vsel %vm1123_vm2, %v2065_v23, -inf  ;;  %v2075_v30 = vadd.f32 %v1626_v24, %v1385_v46 }
 0x2bb   :  { %1158 = vmax.xlane.f32.xlu0 %v1157_v26  ;;  %v1114_v28 = vpop.f32.mrf.mxu1  ;;  %1161 = vmax.xlane.f32.xlu1 %v1160_v27 }
 0x2bc   :  { %v2073_v29 = vadd.f32 %v1385_v46, %v1114_v28  ;;  %v1169_v33 = vsel %vm1123_vm2, %v2075_v30, -inf }
 0x2be   :  { %v1166_v32 = vsel %vm1123_vm2, %v2073_v29, -inf }
 0x2bf   :  { %1164 = vmax.xlane.f32.xlu0 %v1163_v31  ;;  %1167 = vmax.xlane.f32.xlu1 %v1166_v32 }
 0x2c3   :  { %1170 = vmax.xlane.f32.xlu0 %v1169_v33 }
 0x32a   :  { %v1129_v34 = vpop.xlane.xlu1 %1128 }
 0x32b   :  { %v2084_v35 = vsub.f32 %v2022_v48, %v1129_v34 }
 0x32c   :  { %v1126_v36 = vpop.xlane.xlu0 %1125 }
 0x32d   :  { %v1190_v37 = vmul.f32 1.442695, %v2084_v35  ;;  %v2088_v38 = vsub.f32 %v2024_v53, %v1126_v36 }
 0x32f   :  { %1655 = vpow2.f32 %v1190_v37  ;;  %v1188_v39 = vmul.f32 1.442695, %v2088_v38 }
 0x330   :  { %v1135_v40 = vpop.xlane.xlu0 %1134 }
 0x331   :  { %1657 = vpow2.f32 %v1188_v39  ;;  %v2092_v41 = vsub.f32 %v2028_v56, %v1135_v40 }
 0x333   :  { %v1194_v42 = vmul.f32 1.442695, %v2092_v41 }
 0x334   :  { %v1132_v43 = vpop.xlane.xlu0 %1131  ;;  %v1138_v44 = vpop.xlane.xlu1 %1137 }
 0x335   :  { %1659 = vpow2.f32 %v1194_v42  ;;  %v2096_v45 = vsub.f32 %v2032_v60, %v1132_v43  ;;  %v2099_v49 = vsub.f32 %v2036_v63, %v1138_v44 }
 0x337   :  { %v1192_v50 = vmul.f32 1.442695, %v2096_v45  ;;  %v1196_v51 = vmul.f32 1.442695, %v2099_v49 }
 0x338   :  { %v1141_v46 = vpop.xlane.xlu0 %1140  ;;  %v1144_v47 = vpop.xlane.xlu1 %1143 }
 0x339   :  { %1661 = vpow2.f32 %v1192_v50  ;;  %v2104_v48 = vsub.f32 %v2038_v1, %v1141_v46  ;;  %v2106_v52 = vsub.f32 %v1075_v5, %v1144_v47 }
 0x33a   :  { %1663 = vpow2.f32 %v1196_v51 }
 0x33b   :  { %v1198_v53 = vmul.f32 1.442695, %v2104_v48  ;;  %v1200_v54 = vmul.f32 1.442695, %v2106_v52 }
 0x33c   :  { %v1656_v55 = vpop.eup %1655  ;;  %v1147_v56 = vpop.xlane.xlu0 %1146 }
 0x33d   :  { %v1150_v57 = vpop.xlane.xlu1 %1149  ;;  %1665 = vpow2.f32 %v1198_v53  ;;  %v2111_v58 = vsub.f32 %v2044_v7, %v1147_v56  ;;  %v1223_v60 = vsel %vm1123_vm2, %v1656_v55, 0.0 }
 0x33e   :  { %v2114_v59 = vsub.f32 %v2049_v11, %v1150_v57  ;;  %v1658_v61 = vpop.eup %1657  ;;  %1224 = vadd.xlane.f32.xlu0 %v1223_v60  ;;  %1667 = vpow2.f32 %v1200_v54 }
 0x33f   :  { %v1202_v62 = vmul.f32 1.442695, %v2111_v58  ;;  %v1220_v0 = vsel %vm1123_vm2, %v1658_v61, 0.0 }
 0x340   :  { %v1204_v63 = vmul.f32 1.442695, %v2114_v59  ;;  %v1153_v1 = vpop.xlane.xlu0 %1152  ;;  %1221 = vadd.xlane.f32.xlu1 %v1220_v0 }
 0x341   :  { %v1156_v2 = vpop.xlane.xlu1 %1155  ;;  %1669 = vpow2.f32 %v1202_v62  ;;  %v2121_v3 = vsub.f32 %v2051_v13, %v1153_v1 }
 0x342   :  { %v2124_v4 = vsub.f32 %v2057_v17, %v1156_v2  ;;  %v1660_v5 = vpop.eup %1659  ;;  %1671 = vpow2.f32 %v1204_v63 }
 0x343   :  { %v1206_v6 = vmul.f32 1.442695, %v2121_v3  ;;  %v1229_v8 = vsel %vm1123_vm2, %v1660_v5, 0.0 }
 0x344   :  { %v1208_v7 = vmul.f32 1.442695, %v2124_v4  ;;  %v1159_v9 = vpop.xlane.xlu0 %1158  ;;  %1230 = vadd.xlane.f32.xlu0 %v1229_v8 }
 0x345   :  { %v1162_v10 = vpop.xlane.xlu1 %1161  ;;  %1673 = vpow2.f32 %v1206_v6  ;;  %v2130_v11 = vsub.f32 %v2059_v19, %v1159_v9 }
 0x346   :  { %v2133_v12 = vsub.f32 %v2065_v23, %v1162_v10  ;;  %v1662_v13 = vpop.eup %1661  ;;  %1675 = vpow2.f32 %v1208_v7 }
 0x347   :  { %v1664_v14 = vpop.eup %1663  ;;  %v1210_v15 = vmul.f32 1.442695, %v2130_v11  ;;  %v1226_v17 = vsel %vm1123_vm2, %v1662_v13, 0.0 }
 0x348   :  { %v1212_v16 = vmul.f32 1.442695, %v2133_v12  ;;  %v1165_v18 = vpop.xlane.xlu0 %1164  ;;  %1227 = vadd.xlane.f32.xlu1 %v1226_v17  ;;  %v1232_v23 = vsel %vm1123_vm2, %v1664_v14, 0.0 }
 0x349   :  { %v1168_v20 = vpop.xlane.xlu1 %1167  ;;  %1677 = vpow2.f32 %v1210_v15  ;;  %v2139_v21 = vsub.f32 %v2067_v25, %v1165_v18 }
 0x34a   :  { %v2142_v19 = vsub.f32 %v2073_v29, %v1168_v20  ;;  %v1666_v22 = vpop.eup %1665  ;;  %1679 = vpow2.f32 %v1212_v16 }
 0x34b   :  { %v1214_v24 = vmul.f32 1.442695, %v2139_v21  ;;  %v1235_v27 = vsel %vm1123_vm2, %v1666_v22, 0.0  ;;  %v1668_v28 = vpop.eup %1667 }
 0x34c   :  { %v1216_v26 = vmul.f32 1.442695, %v2142_v19  ;;  %1236 = vadd.xlane.f32.xlu0 %v1235_v27  ;;  %v1171_v31 = vpop.xlane.xlu0 %1170  ;;  %1233 = vadd.xlane.f32.xlu1 %v1232_v23  ;;  %v1238_v34 = vsel %vm1123_vm2, %v1668_v28, 0.0 }
 0x34d   :  { %1681 = vpow2.f32 %v1214_v24  ;;  %v2149_v25 = vsub.f32 %v2075_v30, %v1171_v31 }
 0x34e   :  { %v1670_v29 = vpop.eup %1669  ;;  %1683 = vpow2.f32 %v1216_v26 }
 0x34f   :  { %v1218_v32 = vmul.f32 1.442695, %v2149_v25  ;;  %v1241_v33 = vsel %vm1123_vm2, %v1670_v29, 0.0  ;;  %v1672_v36 = vpop.eup %1671 }
 0x350   :  { %1242 = vadd.xlane.f32.xlu0 %v1241_v33  ;;  %1239 = vadd.xlane.f32.xlu1 %v1238_v34  ;;  %v1244_v40 = vsel %vm1123_vm2, %v1672_v36, 0.0 }
 0x351   :  { %1685 = vpow2.f32 %v1218_v32 }
 0x352   :  { %v1674_v37 = vpop.eup %1673 }
 0x353   :  { %v1247_v39 = vsel %vm1123_vm2, %v1674_v37, 0.0  ;;  %v1676_v42 = vpop.eup %1675 }
 0x354   :  { %1248 = vadd.xlane.f32.xlu0 %v1247_v39  ;;  %1245 = vadd.xlane.f32.xlu1 %v1244_v40  ;;  %v1250_v44 = vsel %vm1123_vm2, %v1676_v42, 0.0 }
 0x356   :  { %v1678_v30 = vpop.eup %1677 }
 0x357   :  { %v1253_v43 = vsel %vm1123_vm2, %v1678_v30, 0.0  ;;  %v1680_v50 = vpop.eup %1679 }
 0x358   :  { %1254 = vadd.xlane.f32.xlu0 %v1253_v43  ;;  %1251 = vadd.xlane.f32.xlu1 %v1250_v44  ;;  %v1256_v47 = vsel %vm1123_vm2, %v1680_v50, 0.0 }
 0x35a   :  { %v1682_v51 = vpop.eup %1681 }
 0x35b   :  { %v1259_v46 = vsel %vm1123_vm2, %v1682_v51, 0.0  ;;  %v1684_v53 = vpop.eup %1683 }
 0x35c   :  { %1260 = vadd.xlane.f32.xlu0 %v1259_v46  ;;  %1257 = vadd.xlane.f32.xlu1 %v1256_v47  ;;  %v1262_v56 = vsel %vm1123_vm2, %v1684_v53, 0.0 }
 0x35e   :  { %v1686_v54 = vpop.eup %1685 }
 0x35f   :  { %v1265_v55 = vsel %vm1123_vm2, %v1686_v54, 0.0 }
 0x360   :  { %1266 = vadd.xlane.f32.xlu0 %v1265_v55  ;;  %1263 = vadd.xlane.f32.xlu1 %v1262_v56 }
 0x3c7   :  { %v1225_v57 = vpop.xlane.xlu0 %1224 }
 0x3c8   :  { %1687 = vlog2.f32 %v1225_v57 }
 0x3c9   :  { %v1222_v60 = vpop.xlane.xlu1 %1221 }
 0x3ca   :  { %1689 = vlog2.f32 %v1222_v60 }
 0x3cd   :  { %v1231_v61 = vpop.xlane.xlu0 %1230 }
 0x3ce   :  { %1691 = vlog2.f32 %v1231_v61 }
 0x3d1   :  { %v1228_v62 = vpop.xlane.xlu1 %1227 }
 0x3d2   :  { %1693 = vlog2.f32 %v1228_v62 }
 0x3d5   :  { %v1688_v63 = vpop.eup %1687  ;;  %v1237_v0 = vpop.xlane.xlu0 %1236 }
 0x3d6   :  { %v1234_v1 = vpop.xlane.xlu1 %1233  ;;  %v1271_v2 = vmul.f32 0.6931472, %v1688_v63  ;;  %1695 = vlog2.f32 %v1237_v0 }
 0x3d7   :  { %v1690_v5 = vpop.eup %1689  ;;  %1697 = vlog2.f32 %v1234_v1 }
 0x3d8   :  { %v1301_v6 = vsub.f32 %v2084_v35, %v1271_v2  ;;  %v1269_v7 = vmul.f32 0.6931472, %v1690_v5 }
 0x3d9   :  { %v1243_v8 = vpop.xlane.xlu0 %1242 }
 0x3da   :  { %v1240_v9 = vpop.xlane.xlu1 %1239  ;;  %1317 = vst.msk [vmem:[%s2251_s9 + $0x8] sm:$0xff] %vm1123_vm2, %v1301_v6  ;;  %v1300_v10 = vsub.f32 %v2088_v38, %v1269_v7  ;;  %1699 = vlog2.f32 %v1243_v8 }
 0x3db   :  { %v1692_v13 = vpop.eup %1691  ;;  %1701 = vlog2.f32 %v1240_v9 }
 0x3dc   :  { %1316 = vst.msk [vmem:[%s2251_s9] sm:$0xff] %vm1123_vm2, %v1300_v10  ;;  %v1275_v14 = vmul.f32 0.6931472, %v1692_v13 }
 0x3dd   :  { %v1249_v35 = vpop.xlane.xlu0 %1248 }
 0x3de   :  { %v1246_v15 = vpop.xlane.xlu1 %1245  ;;  %v1303_v16 = vsub.f32 %v2092_v41, %v1275_v14  ;;  %1703 = vlog2.f32 %v1249_v35 }
 0x3df   :  { %v1694_v17 = vpop.eup %1693  ;;  %1705 = vlog2.f32 %v1246_v15 }
 0x3e0   :  { %1319 = vst.msk [vmem:[%s2251_s9 + $0x18] sm:$0xff] %vm1123_vm2, %v1303_v16  ;;  %v1273_v38 = vmul.f32 0.6931472, %v1694_v17 }
 0x3e1   :  { %v1255_v18 = vpop.xlane.xlu0 %1254 }
 0x3e2   :  { %v1252_v20 = vpop.xlane.xlu1 %1251  ;;  %v1302_v22 = vsub.f32 %v2096_v45, %v1273_v38  ;;  %1707 = vlog2.f32 %v1255_v18 }
 0x3e3   :  { %v1696_v23 = vpop.eup %1695  ;;  %1709 = vlog2.f32 %v1252_v20 }
 0x3e4   :  { %v1698_v24 = vpop.eup %1697  ;;  %1318 = vst.msk [vmem:[%s2251_s9 + $0x10] sm:$0xff] %vm1123_vm2, %v1302_v22  ;;  %v1279_v41 = vmul.f32 0.6931472, %v1696_v23 }
 0x3e5   :  { %v1277_v26 = vmul.f32 0.6931472, %v1698_v24  ;;  %v1261_v27 = vpop.xlane.xlu0 %1260 }
 0x3e6   :  { %v1258_v28 = vpop.xlane.xlu1 %1257  ;;  %v1305_v31 = vsub.f32 %v2104_v48, %v1279_v41  ;;  %1711 = vlog2.f32 %v1261_v27 }
 0x3e7   :  { %v1700_v29 = vpop.eup %1699  ;;  %v1304_v32 = vsub.f32 %v2099_v49, %v1277_v26  ;;  %1713 = vlog2.f32 %v1258_v28 }
 0x3e8   :  { %v1702_v45 = vpop.eup %1701  ;;  %1321 = vst.msk [vmem:[%s2251_s9 + $0x28] sm:$0xff] %vm1123_vm2, %v1305_v31  ;;  %v1283_v33 = vmul.f32 0.6931472, %v1700_v29 }
 0x3e9   :  { %1320 = vst.msk [vmem:[%s2251_s9 + $0x20] sm:$0xff] %vm1123_vm2, %v1304_v32  ;;  %v1281_v34 = vmul.f32 0.6931472, %v1702_v45  ;;  %v1267_v36 = vpop.xlane.xlu0 %1266 }
 0x3ea   :  { %v1264_v48 = vpop.xlane.xlu1 %1263  ;;  %v1307_v37 = vsub.f32 %v2111_v58, %v1283_v33  ;;  %1715 = vlog2.f32 %v1267_v36 }
 0x3eb   :  { %v1704_v49 = vpop.eup %1703  ;;  %v1306_v39 = vsub.f32 %v2106_v52, %v1281_v34  ;;  %1717 = vlog2.f32 %v1264_v48 }
 0x3ec   :  { %v1706_v40 = vpop.eup %1705  ;;  %1323 = vst.msk [vmem:[%s2251_s9 + $0x38] sm:$0xff] %vm1123_vm2, %v1307_v37  ;;  %v1287_v42 = vmul.f32 0.6931472, %v1704_v49 }
 0x3ed   :  { %1322 = vst.msk [vmem:[%s2251_s9 + $0x30] sm:$0xff] %vm1123_vm2, %v1306_v39  ;;  %v1285_v30 = vmul.f32 0.6931472, %v1706_v40 }
 0x3ee   :  { %v1309_v58 = vsub.f32 %v2121_v3, %v1287_v42 }
 0x3ef   :  { %v1708_v43 = vpop.eup %1707  ;;  %v1308_v44 = vsub.f32 %v2114_v59, %v1285_v30 }
 0x3f0   :  { %v1710_v52 = vpop.eup %1709  ;;  %1325 = vst.msk [vmem:[%s2251_s9 + $0x48] sm:$0xff] %vm1123_vm2, %v1309_v58  ;;  %v1291_v50 = vmul.f32 0.6931472, %v1708_v43 }
 0x3f1   :  { %1324 = vst.msk [vmem:[%s2251_s9 + $0x40] sm:$0xff] %vm1123_vm2, %v1308_v44  ;;  %v1289_v51 = vmul.f32 0.6931472, %v1710_v52 }
 0x3f2   :  { %v1311_v46 = vsub.f32 %v2130_v11, %v1291_v50 }
 0x3f3   :  { %v1712_v47 = vpop.eup %1711  ;;  %v1310_v3 = vsub.f32 %v2124_v4, %v1289_v51 }
 0x3f4   :  { %v1714_v53 = vpop.eup %1713  ;;  %1327 = vst.msk [vmem:[%s2251_s9 + $0x58] sm:$0xff] %vm1123_vm2, %v1311_v46  ;;  %v1295_v59 = vmul.f32 0.6931472, %v1712_v47 }
 0x3f5   :  { %1326 = vst.msk [vmem:[%s2251_s9 + $0x50] sm:$0xff] %vm1123_vm2, %v1310_v3  ;;  %v1293_v54 = vmul.f32 0.6931472, %v1714_v53 }
 0x3f6   :  { %v1313_v55 = vsub.f32 %v2139_v21, %v1295_v59 }
 0x3f7   :  { %v1716_v56 = vpop.eup %1715  ;;  %v1312_v11 = vsub.f32 %v2133_v12, %v1293_v54 }
 0x3f8   :  { %v1718_v57 = vpop.eup %1717  ;;  %1329 = vst.msk [vmem:[%s2251_s9 + $0x68] sm:$0xff] %vm1123_vm2, %v1313_v55  ;;  %v1299_v4 = vmul.f32 0.6931472, %v1716_v56 }
 0x3f9   :  { %1328 = vst.msk [vmem:[%s2251_s9 + $0x60] sm:$0xff] %vm1123_vm2, %v1312_v11  ;;  %v1297_v60 = vmul.f32 0.6931472, %v1718_v57 }
 0x3fa   :  { %v1315_v61 = vsub.f32 %v2149_v25, %v1299_v4 }
 0x3fb   :  { %v1314_v21 = vsub.f32 %v2142_v19, %v1297_v60 }
 0x3fc   :  { %1331 = vst.msk [vmem:[%s2251_s9 + $0x78] sm:$0xff] %vm1123_vm2, %v1315_v61 }
 0x3fd   :  { %1330 = vst.msk [vmem:[%s2251_s9 + $0x70] sm:$0xff] %vm1123_vm2, %v1314_v21 }

</bundles_post_ra>
